<compile_context>
chip_gen: v7x
topology: tpu7x:2x2x1
jax: 0.10.0
libtpu: 0.0.40
codegen_flags: <defaults>
</compile_context>

<pallas_src>
import functools

import jax
import jax.numpy as jnp
from jax.experimental import pallas as pl
from jax.experimental.pallas import tpu as pltpu

_LANE = 128
_SUBLANE = 8


def _round_up(x, m):
    return (x + m - 1) // m * m


def _chip_knobs():
    """(row_tile, vmem_limit_bytes, fused_resident_budget_bytes) per chip gen."""
    row_tile, vmem_limit, fused_budget = 512, 48 << 20, 24 << 20  # v7x-safe
    try:
        vmem = int(getattr(pltpu.get_tpu_info(), "vmem_capacity_bytes", 0))
        if vmem >= (100 << 20):  # v5e / v6e: 128 MiB VMEM
            row_tile, vmem_limit, fused_budget = 1024, 96 << 20, 64 << 20
    except Exception:
        pass  # unknown chip: keep conservative (v7x-sized) defaults
    return row_tile, vmem_limit, fused_budget


_ROW_TILE, _VMEM_LIMIT, _FUSED_BUDGET = _chip_knobs()


def _pick_row_tiling(rows):
    rows_pad = _round_up(rows, _SUBLANE)
    tile = min(_ROW_TILE, rows_pad)
    rows_pad = _round_up(rows_pad, tile)
    return rows_pad, tile


def _pad2(a, r, c):
    # Single jnp.pad (zero) to the padded (rows, lanes) shape.
    return jnp.pad(a, ((0, r - a.shape[0]), (0, c - a.shape[1])))


# ----------------------------------------------------------------------------
# Kernels
# ----------------------------------------------------------------------------
def _mm_bias_act_kernel(p_ref, w_ref, b_ref, o_ref, *, act):
    # p_ref: (tile, Kp) bf16, w_ref: (Kp, Cp) bf16, b_ref: (1, Cp) f32
    y = jnp.dot(p_ref[...], w_ref[...], preferred_element_type=jnp.float32)
    y = y + b_ref[...]
    if act == "leaky_relu":
        y = jnp.where(y >= 0.0, y, 0.2 * y)
    elif act == "sigmoid":
        y = 1.0 / (1.0 + jnp.exp(-y))  # exact (output feeds a BCE-style loss)
    o_ref[...] = y.astype(o_ref.dtype)


def _channel_sums(y):
    s = jnp.sum(y, axis=0, keepdims=True)
    ss = jnp.sum(y * y, axis=0, keepdims=True)
    return jnp.concatenate([s, ss], axis=0)  # (2, Cp)


def _mm_bias_bn_act_fused_kernel(p_ref, w_ref, b_ref, g_ref, beta_ref, o_ref,
                                 stats_ref, *, rows_valid, tile_rows,
                                 num_tiles, eps):
    # Fused BN layer: matmul+bias per row tile into a VMEM-resident bf16
    # output, f32 sum/sumsq accumulated in scratch, normalize + LeakyReLU in
    # place on the last grid step.  Grid axis must be "arbitrary".
    i = pl.program_id(0)
    nt = pl.num_programs(0)

    @pl.when(i == 0)
    def _():
        stats_ref[...] = jnp.zeros_like(stats_ref)

    y = jnp.dot(p_ref[...], w_ref[...], preferred_element_type=jnp.float32)
    y = y + b_ref[...]

    off = pl.multiple_of(i * tile_rows, tile_rows)
    o_ref[pl.ds(off, tile_rows), :] = y.astype(o_ref.dtype)

    # Only the last tile can contain padded rows; gate the mask work there.
    if rows_valid % tile_rows == 0:
        stats_ref[...] += _channel_sums(y)
    else:
        @pl.when(i < nt - 1)
        def _():
            stats_ref[...] += _channel_sums(y)

        @pl.when(i == nt - 1)
        def _():
            row = i * tile_rows + jax.lax.broadcasted_iota(jnp.int32, y.shape, 0)
            ym = jnp.where(row < rows_valid, y, 0.0)
            stats_ref[...] += _channel_sums(ym)

    @pl.when(i == nt - 1)
    def _():
        st = stats_ref[...]
        inv_n = 1.0 / float(rows_valid)
        mean = st[0:1, :] * inv_n
        var = jnp.maximum(st[1:2, :] * inv_n - mean * mean, 0.0)
        scale = jax.lax.rsqrt(var + eps) * g_ref[...]
        shift = beta_ref[...] - mean * scale

        def body(t, carry):
            toff = pl.multiple_of(t * tile_rows, tile_rows)
            yv = o_ref[pl.ds(toff, tile_rows), :].astype(jnp.float32)
            yn = yv * scale + shift
            o_ref[pl.ds(toff, tile_rows), :] = jnp.where(
                yn >= 0.0, yn, 0.2 * yn).astype(o_ref.dtype)
            return carry

        jax.lax.fori_loop(0, num_tiles, body, 0)


def _mm_bias_partial_stats_kernel(p_ref, w_ref, b_ref, y_ref, stats_ref, *,
                                  rows_valid, tile_rows):
    # Two-pass fallback, pass 1: matmul + bias, bf16 y tile out, per-tile
    # partial (2, Cp) stats out.  Fully "parallel" (megacore-friendly).
    i = pl.program_id(0)
    nt = pl.num_programs(0)
    y = jnp.dot(p_ref[...], w_ref[...], preferred_element_type=jnp.float32)
    y = y + b_ref[...]
    y_ref[...] = y.astype(y_ref.dtype)

    if rows_valid % tile_rows == 0:
        stats_ref[...] = _channel_sums(y)[None, :, :]
    else:
        @pl.when(i < nt - 1)
        def _():
            stats_ref[...] = _channel_sums(y)[None, :, :]

        @pl.when(i == nt - 1)
        def _():
            row = i * tile_rows + jax.lax.broadcasted_iota(jnp.int32, y.shape, 0)
            ym = jnp.where(row < rows_valid, y, 0.0)
            stats_ref[...] = _channel_sums(ym)[None, :, :]


def _bn_act_kernel(y_ref, stats_ref, g_ref, beta_ref, o_ref, *, rows_valid, eps):
    # Two-pass fallback, pass 2: normalize with batch stats (biased var),
    # affine, LeakyReLU(0.2).  Row-tile axis "parallel".
    y = y_ref[...].astype(jnp.float32)
    st = stats_ref[...]
    inv_n = 1.0 / float(rows_valid)
    mean = st[0:1, :] * inv_n
    var = jnp.maximum(st[1:2, :] * inv_n - mean * mean, 0.0)
    scale = jax.lax.rsqrt(var + eps) * g_ref[...]
    shift = beta_ref[...] - mean * scale
    yn = y * scale + shift
    o_ref[...] = jnp.where(yn >= 0.0, yn, 0.2 * yn).astype(o_ref.dtype)


# ----------------------------------------------------------------------------
# Pallas wrappers (lane-dense Cp / Kp padding, row tiling)
# ----------------------------------------------------------------------------
def _prep_operands(patches, w_mat, rows_pad, kp, cp):
    p = _pad2(patches, rows_pad, kp)                       # already bf16
    w = _pad2(w_mat.astype(jnp.bfloat16), kp, cp)
    return p, w


def _pad_row_vec(v, cp):
    return _pad2(v.reshape(1, -1).astype(jnp.float32), 1, cp)


def _conv_act(patches, w_mat, b_vec, act, out_dtype):
    rows, k = patches.shape
    cout = w_mat.shape[1]
    cp = _round_up(cout, _LANE)
    kp = _round_up(k, _LANE)
    rows_pad, tile = _pick_row_tiling(rows)
    p, w = _prep_operands(patches, w_mat, rows_pad, kp, cp)
    b = _pad_row_vec(b_vec, cp)

    y = pl.pallas_call(
        functools.partial(_mm_bias_act_kernel, act=act),
        out_shape=jax.ShapeDtypeStruct((rows_pad, cp), out_dtype),
        grid=(rows_pad // tile,),
        in_specs=[
            pl.BlockSpec((tile, kp), lambda i: (i, 0)),
            pl.BlockSpec((kp, cp), lambda i: (0, 0)),
            pl.BlockSpec((1, cp), lambda i: (0, 0)),
        ],
        out_specs=pl.BlockSpec((tile, cp), lambda i: (i, 0)),
        compiler_params=pltpu.CompilerParams(
            dimension_semantics=("parallel",),
            vmem_limit_bytes=_VMEM_LIMIT,
        ),
    )(p, w, b)
    return y[:rows, :cout]


def _conv_bn_act(patches, w_mat, b_vec, gamma, beta, eps=1e-5):
    rows, k = patches.shape
    cout = w_mat.shape[1]
    cp = _round_up(cout, _LANE)
    kp = _round_up(k, _LANE)
    rows_pad, tile = _pick_row_tiling(rows)
    p, w = _prep_operands(patches, w_mat, rows_pad, kp, cp)
    b = _pad_row_vec(b_vec, cp)
    g = _pad_row_vec(gamma, cp)
    bt = _pad_row_vec(beta, cp)

    num_tiles = rows_pad // tile
    grid = (num_tiles,)

    # VMEM footprint of the fused (single-pass) variant: resident bf16
    # activation + resident bf16 weights + double-buffered bf16 patch tile.
    resident_bytes = rows_pad * cp * 2
    stream_bytes = kp * cp * 2 + 2 * tile * kp * 2 + 8 * cp * 4

    if resident_bytes + stream_bytes <= _FUSED_BUDGET:
        out = pl.pallas_call(
            functools.partial(_mm_bias_bn_act_fused_kernel,
                              rows_valid=rows, tile_rows=tile,
                              num_tiles=num_tiles, eps=eps),
            out_shape=jax.ShapeDtypeStruct((rows_pad, cp), jnp.bfloat16),
            grid=grid,
            in_specs=[
                pl.BlockSpec((tile, kp), lambda i: (i, 0)),
                pl.BlockSpec((kp, cp), lambda i: (0, 0)),
                pl.BlockSpec((1, cp), lambda i: (0, 0)),
                pl.BlockSpec((1, cp), lambda i: (0, 0)),
                pl.BlockSpec((1, cp), lambda i: (0, 0)),
            ],
            out_specs=pl.BlockSpec((rows_pad, cp), lambda i: (0, 0)),  # resident
            scratch_shapes=[pltpu.VMEM((2, cp), jnp.float32)],
            compiler_params=pltpu.CompilerParams(
                dimension_semantics=("arbitrary",),
                vmem_limit_bytes=_VMEM_LIMIT,
            ),
        )(p, w, b, g, bt)
        return out[:rows, :cout]

    # Fallback: two passes, bf16 intermediate, per-tile partial stats so both
    # passes stay "parallel" (shards across v7x's two TensorCores).
    y, partial = pl.pallas_call(
        functools.partial(_mm_bias_partial_stats_kernel,
                          rows_valid=rows, tile_rows=tile),
        out_shape=(
            jax.ShapeDtypeStruct((rows_pad, cp), jnp.bfloat16),
            jax.ShapeDtypeStruct((num_tiles, 2, cp), jnp.float32),
        ),
        grid=grid,
        in_specs=[
            pl.BlockSpec((tile, kp), lambda i: (i, 0)),
            pl.BlockSpec((kp, cp), lambda i: (0, 0)),
            pl.BlockSpec((1, cp), lambda i: (0, 0)),
        ],
        out_specs=(
            pl.BlockSpec((tile, cp), lambda i: (i, 0)),
            pl.BlockSpec((1, 2, cp), lambda i: (i, 0, 0)),
        ),
        compiler_params=pltpu.CompilerParams(
            dimension_semantics=("parallel",),
            vmem_limit_bytes=_VMEM_LIMIT,
        ),
    )(p, w, b)
    stats = jnp.sum(partial, axis=0)  # (2, cp) — tiny cross-tile reduction

    out = pl.pallas_call(
        functools.partial(_bn_act_kernel, rows_valid=rows, eps=eps),
        out_shape=jax.ShapeDtypeStruct((rows_pad, cp), jnp.bfloat16),
        grid=grid,
        in_specs=[
            pl.BlockSpec((tile, cp), lambda i: (i, 0)),
            pl.BlockSpec((2, cp), lambda i: (0, 0)),
            pl.BlockSpec((1, cp), lambda i: (0, 0)),
            pl.BlockSpec((1, cp), lambda i: (0, 0)),
        ],
        out_specs=pl.BlockSpec((tile, cp), lambda i: (i, 0)),
        compiler_params=pltpu.CompilerParams(
            dimension_semantics=("parallel",),
            vmem_limit_bytes=_VMEM_LIMIT,
        ),
    )(y, stats, g, bt)
    return out[:rows, :cout]


def _conv_sigmoid(patches, w_mat, b_vec):
    rows, k = patches.shape
    cout = w_mat.shape[1]
    if rows < _LANE and cout < _LANE:
        # Per perf review: for the tiny final layer (rows == batch, Cout == 1)
        # the 128-lane padding + pallas_call launch overhead dominate; a single
        # fused XLA dot with an exact sigmoid is cheaper and tighter-bounded.
        y = jnp.dot(patches, w_mat.astype(jnp.bfloat16),
                    preferred_element_type=jnp.float32)
        y = y + b_vec.reshape(1, -1).astype(jnp.float32)
        return jax.nn.sigmoid(y)
    return _conv_act(patches, w_mat, b_vec, act="sigmoid", out_dtype=jnp.float32)


# ----------------------------------------------------------------------------
# Plain-JAX glue: NHWC im2col (layout only, bf16, no math)
# ----------------------------------------------------------------------------
def _im2col_nhwc(x, kh, kw, stride, pad):
    n, h, w, c = x.shape
    xp = jnp.pad(x, ((0, 0), (pad, pad), (pad, pad), (0, 0)))
    hp, wp = h + 2 * pad, w + 2 * pad
    oh = (hp - kh) // stride + 1
    ow = (wp - kw) // stride + 1
    cols = []
    for i in range(kh):
        for j in range(kw):
            cols.append(xp[:, i:i + stride * oh:stride, j:j + stride * ow:stride, :])
    p = jnp.stack(cols, axis=3)                    # (N, OH, OW, KH*KW, C)
    p = p.reshape(n * oh * ow, kh * kw * c)        # column order = (i*KW+j)*C + c
    return p, oh, ow


def _weight_to_mat(w):
    # (Cout, Cin, KH, KW) -> (KH*KW*Cin, Cout), matching the NHWC patch order.
    cout, cin, kh, kw = w.shape
    return w.transpose(2, 3, 1, 0).reshape(kh * kw * cin, cout)


# ----------------------------------------------------------------------------
# Parameter init (matches torch: conv weight ~ N(0, 0.02), bias = 0,
#                 BatchNorm gamma = 1, beta = 0)
# ----------------------------------------------------------------------------
def init_discriminator_params(key, input_dim, num_filters, output_dim):
    hidden = []
    chans = [input_dim] + list(num_filters)
    for i in range(len(num_filters)):
        key, sub = jax.random.split(key)
        w = 0.02 * jax.random.normal(sub, (num_filters[i], chans[i], 4, 4), jnp.float32)
        b = jnp.zeros((num_filters[i],), jnp.float32)
        if i == 0:
            gamma, beta = None, None
        else:
            gamma = jnp.ones((num_filters[i],), jnp.float32)
            beta = jnp.zeros((num_filters[i],), jnp.float32)
        hidden.append((w, b, gamma, beta))
    key, sub = jax.random.split(key)
    w_out = 0.02 * jax.random.normal(sub, (output_dim, num_filters[-1], 4, 4), jnp.float32)
    b_out = jnp.zeros((output_dim,), jnp.float32)
    return hidden, (w_out, b_out)


# ----------------------------------------------------------------------------
# Forward pass (same semantics as Discriminator.forward, training-mode BN)
# ----------------------------------------------------------------------------
def discriminator_forward(x, hidden_params, out_params):
    n = x.shape[0]
    # NCHW -> NHWC once at the boundary; bf16 activations so im2col patches
    # are materialized once, in bf16.
    h = jnp.transpose(x, (0, 2, 3, 1)).astype(jnp.bfloat16)
    for i, (w, b, gamma, beta) in enumerate(hidden_params):
        cout, _, kh, kw = w.shape
        w_mat = _weight_to_mat(w)
        patches, oh, ow = _im2col_nhwc(h, kh, kw, stride=2, pad=1)
        if i == 0:
            y = _conv_act(patches, w_mat, b, act="leaky_relu",
                          out_dtype=jnp.bfloat16)
        else:
            y = _conv_bn_act(patches, w_mat, b, gamma, beta)
        h = y.reshape(n, oh, ow, cout)          # stay NHWC bf16 between layers

    w, b = out_params
    cout, _, kh, kw = w.shape
    w_mat = _weight_to_mat(w)
    patches, oh, ow = _im2col_nhwc(h, kh, kw, stride=1, pad=0)
    y = _conv_sigmoid(patches, w_mat, b)
    out = y.reshape(n, oh, ow, cout).transpose(0, 3, 1, 2)  # NCHW at the boundary
    return out.astype(jnp.float32)


if __name__ == "__main__":
    key = jax.random.PRNGKey(0)

    # Discriminator(input_dim=4, num_filters=[8, 16], output_dim=1)
    input_dim, num_filters, output_dim = 4, [8, 16], 1
    batch, spatial = 2, 16          # 16 -> 8 -> 4 -> final 4x4 conv -> 1x1

    key, pk, xk = jax.random.split(key, 3)
    hidden_params, out_params = init_discriminator_params(
        pk, input_dim, num_filters, output_dim
    )
    x = jax.random.normal(xk, (batch, input_dim, spatial, spatial), jnp.float32)

    fwd = jax.jit(discriminator_forward)
    out = jax.block_until_ready(fwd(x, hidden_params, out_params))

    assert out.shape == (batch, output_dim, 1, 1), out.shape
    assert bool(jnp.all(jnp.isfinite(out)))
    assert bool(jnp.all((out >= 0.0) & (out <= 1.0)))
    print("KERNEL_OK")
</pallas_src>

<mosaic_0001>
module attributes {stable_mosaic.version = 11 : i64} {
  func.func @_mm_bias_act_kernel(%arg0: i32, %arg1: memref<128x128xbf16, #tpu.memory_space<vmem>>, %arg2: memref<128x128xbf16, #tpu.memory_space<vmem>>, %arg3: memref<1x128xf32, #tpu.memory_space<vmem>>, %arg4: memref<128x128xbf16, #tpu.memory_space<vmem>>) attributes {dimension_semantics = [#tpu.dimension_semantics<parallel>], iteration_bounds = array<i64: 1>, scalar_prefetch = 0 : i64, scratch_operands = 0 : i64, tpu.core_type = #tpu.core_type<tc>, window_params = [{transform_indices = @transform_0, window_bounds = array<i64: 128, 128>}, {pipeline_mode = #tpu.pipeline_mode<synchronous>, transform_indices = @transform_1, window_bounds = array<i64: 128, 128>}, {pipeline_mode = #tpu.pipeline_mode<synchronous>, transform_indices = @transform_2, window_bounds = array<i64: 1, 128>}, {transform_indices = @transform_3, window_bounds = array<i64: 128, 128>}]} {
    %c0 = arith.constant 0 : index
    %c0_0 = arith.constant 0 : index
    %0 = vector.load %arg1[%c0, %c0_0] : memref<128x128xbf16, #tpu.memory_space<vmem>>, vector<128x128xbf16>
    %c0_1 = arith.constant 0 : index
    %c0_2 = arith.constant 0 : index
    %1 = vector.load %arg2[%c0_1, %c0_2] : memref<128x128xbf16, #tpu.memory_space<vmem>>, vector<128x128xbf16>
    %cst = arith.constant dense<0.000000e+00> : vector<128x128xf32>
    %2 = tpu.matmul %0, %1, %cst {dimension_numbers = #tpu.dot_dimension_numbers<[1], [0], [0], [1], [0, 0, 1, 1], [], []>} : vector<128x128xbf16>, vector<128x128xbf16>, vector<128x128xf32> -> vector<128x128xf32>
    %c0_3 = arith.constant 0 : index
    %c0_4 = arith.constant 0 : index
    %3 = vector.load %arg3[%c0_3, %c0_4] : memref<1x128xf32, #tpu.memory_space<vmem>>, vector<1x128xf32>
    %4 = vector.broadcast %3 : vector<1x128xf32> to vector<128x128xf32>
    %5 = arith.addf %2, %4 : vector<128x128xf32>
    %cst_5 = arith.constant 0.000000e+00 : f32
    %6 = vector.broadcast %cst_5 : f32 to vector<128x128xf32>
    %7 = arith.cmpf oge, %5, %6 : vector<128x128xf32>
    %cst_6 = arith.constant 2.000000e-01 : f32
    %8 = vector.broadcast %cst_6 : f32 to vector<128x128xf32>
    %9 = arith.mulf %8, %5 : vector<128x128xf32>
    %10 = arith.select %7, %5, %9 : vector<128x128xi1>, vector<128x128xf32>
    %11 = arith.truncf %10 : vector<128x128xf32> to vector<128x128xbf16>
    %c0_7 = arith.constant 0 : index
    %c0_8 = arith.constant 0 : index
    %12 = vector.load %arg4[%c0_7, %c0_8] : memref<128x128xbf16, #tpu.memory_space<vmem>>, vector<128x128xbf16>
    tpu.vector_store %arg4[%c0_7, %c0_8], %11 {strides = array<i32>} : memref<128x128xbf16, #tpu.memory_space<vmem>>, vector<128x128xbf16>,
    return
  }
  func.func @transform_0(%arg0: i32) -> (i32, i32) {
    %c0_i32 = arith.constant 0 : i32
    %c0_i32_0 = arith.constant 0 : i32
    return %arg0, %c0_i32 : i32, i32
  }
  func.func @transform_1(%arg0: i32) -> (i32, i32) {
    %c0_i32 = arith.constant 0 : i32
    %c0_i32_0 = arith.constant 0 : i32
    %c0_i32_1 = arith.constant 0 : i32
    return %c0_i32, %c0_i32_0 : i32, i32
  }
  func.func @transform_2(%arg0: i32) -> (i32, i32) {
    %c0_i32 = arith.constant 0 : i32
    %c0_i32_0 = arith.constant 0 : i32
    %c0_i32_1 = arith.constant 0 : i32
    return %c0_i32, %c0_i32_0 : i32, i32
  }
  func.func @transform_3(%arg0: i32) -> (i32, i32) {
    %c0_i32 = arith.constant 0 : i32
    %c0_i32_0 = arith.constant 0 : i32
    return %arg0, %c0_i32 : i32, i32
  }
}

module attributes {stable_mosaic.version = 11 : i64} {
  func.func @_mm_bias_bn_act_fused_kernel(%arg0: i32, %arg1: memref<32x128xbf16, #tpu.memory_space<vmem>>, %arg2: memref<128x128xbf16, #tpu.memory_space<vmem>>, %arg3: memref<1x128xf32, #tpu.memory_space<vmem>>, %arg4: memref<1x128xf32, #tpu.memory_space<vmem>>, %arg5: memref<1x128xf32, #tpu.memory_space<vmem>>, %arg6: memref<32x128xbf16, #tpu.memory_space<vmem>>, %arg7: memref<2x128xf32, #tpu.memory_space<vmem>>) attributes {dimension_semantics = [#tpu.dimension_semantics<arbitrary>], iteration_bounds = array<i64: 1>, scalar_prefetch = 0 : i64, scratch_operands = 1 : i64, tpu.core_type = #tpu.core_type<tc>, window_params = [{transform_indices = @transform_0, window_bounds = array<i64: 32, 128>}, {pipeline_mode = #tpu.pipeline_mode<synchronous>, transform_indices = @transform_1, window_bounds = array<i64: 128, 128>}, {pipeline_mode = #tpu.pipeline_mode<synchronous>, transform_indices = @transform_2, window_bounds = array<i64: 1, 128>}, {pipeline_mode = #tpu.pipeline_mode<synchronous>, transform_indices = @transform_3, window_bounds = array<i64: 1, 128>}, {pipeline_mode = #tpu.pipeline_mode<synchronous>, transform_indices = @transform_4, window_bounds = array<i64: 1, 128>}, {pipeline_mode = #tpu.pipeline_mode<synchronous>, transform_indices = @transform_5, window_bounds = array<i64: 32, 128>}]} {
    %c0_i32 = arith.constant 0 : i32
    %0 = arith.cmpi eq, %arg0, %c0_i32 : i32
    %1 = arith.extui %0 : i1 to i32
    %c0_i32_0 = arith.constant 0 : i32
    %2 = arith.cmpi ne, %1, %c0_i32_0 : i32
    scf.if %2 {
      %cst_15 = arith.constant 0.000000e+00 : f32
      %26 = vector.broadcast %cst_15 : f32 to vector<2x128xf32>
      %c0_16 = arith.constant 0 : index
      %c0_17 = arith.constant 0 : index
      %27 = vector.load %arg7[%c0_16, %c0_17] : memref<2x128xf32, #tpu.memory_space<vmem>>, vector<2x128xf32>
      tpu.vector_store %arg7[%c0_16, %c0_17], %26 {strides = array<i32>} : memref<2x128xf32, #tpu.memory_space<vmem>>, vector<2x128xf32>,
    } else {
    }
    %c0 = arith.constant 0 : index
    %c0_1 = arith.constant 0 : index
    %3 = vector.load %arg1[%c0, %c0_1] : memref<32x128xbf16, #tpu.memory_space<vmem>>, vector<32x128xbf16>
    %c0_2 = arith.constant 0 : index
    %c0_3 = arith.constant 0 : index
    %4 = vector.load %arg2[%c0_2, %c0_3] : memref<128x128xbf16, #tpu.memory_space<vmem>>, vector<128x128xbf16>
    %cst = arith.constant dense<0.000000e+00> : vector<32x128xf32>
    %5 = tpu.matmul %3, %4, %cst {dimension_numbers = #tpu.dot_dimension_numbers<[1], [0], [0], [1], [0, 0, 1, 1], [], []>} : vector<32x128xbf16>, vector<128x128xbf16>, vector<32x128xf32> -> vector<32x128xf32>
    %c0_4 = arith.constant 0 : index
    %c0_5 = arith.constant 0 : index
    %6 = vector.load %arg3[%c0_4, %c0_5] : memref<1x128xf32, #tpu.memory_space<vmem>>, vector<1x128xf32>
    %7 = vector.broadcast %6 : vector<1x128xf32> to vector<32x128xf32>
    %8 = arith.addf %5, %7 : vector<32x128xf32>
    %c32_i32 = arith.constant 32 : i32
    %9 = arith.muli %arg0, %c32_i32 : i32
    %10 = tpu.assume_multiple %9, 32 : i32
    %11 = arith.truncf %8 : vector<32x128xf32> to vector<32x128xbf16>
    %12 = arith.index_cast %10 : i32 to index
    %c0_6 = arith.constant 0 : index
    %13 = vector.load %arg6[%12, %c0_6] : memref<32x128xbf16, #tpu.memory_space<vmem>>, vector<32x128xbf16>
    tpu.vector_store %arg6[%12, %c0_6], %11 {strides = array<i32>} : memref<32x128xbf16, #tpu.memory_space<vmem>>, vector<32x128xbf16>,
    %c0_7 = arith.constant 0 : index
    %c0_8 = arith.constant 0 : index
    %14 = vector.load %arg7[%c0_7, %c0_8] : memref<2x128xf32, #tpu.memory_space<vmem>>, vector<2x128xf32>
    %cst_9 = arith.constant dense<0.000000e+00> : vector<128xf32>
    %15 = vector.multi_reduction <add>, %8, %cst_9 [0] : vector<32x128xf32> to vector<128xf32>
    %16 = vector.shape_cast %15 : vector<128xf32> to vector<1x128xf32>
    %17 = arith.mulf %8, %8 : vector<32x128xf32>
    %cst_10 = arith.constant dense<0.000000e+00> : vector<128xf32>
    %18 = vector.multi_reduction <add>, %17, %cst_10 [0] : vector<32x128xf32> to vector<128xf32>
    %19 = vector.shape_cast %18 : vector<128xf32> to vector<1x128xf32>
    %20 = tpu.concatenate %16, %19 in 0 : vector<1x128xf32>, vector<1x128xf32> -> vector<2x128xf32>
    %21 = arith.addf %14, %20 : vector<2x128xf32>
    %c0_11 = arith.constant 0 : index
    %c0_12 = arith.constant 0 : index
    %22 = vector.load %arg7[%c0_11, %c0_12] : memref<2x128xf32, #tpu.memory_space<vmem>>, vector<2x128xf32>
    tpu.vector_store %arg7[%c0_11, %c0_12], %21 {strides = array<i32>} : memref<2x128xf32, #tpu.memory_space<vmem>>, vector<2x128xf32>,
    %c0_i32_13 = arith.constant 0 : i32
    %23 = arith.cmpi eq, %arg0, %c0_i32_13 : i32
    %24 = arith.extui %23 : i1 to i32
    %c0_i32_14 = arith.constant 0 : i32
    %25 = arith.cmpi ne, %24, %c0_i32_14 : i32
    scf.if %25 {
      %c0_15 = arith.constant 0 : index
      %c0_16 = arith.constant 0 : index
      %26 = vector.load %arg7[%c0_15, %c0_16] : memref<2x128xf32, #tpu.memory_space<vmem>>, vector<2x128xf32>
      %27 = vector.extract_strided_slice %26 {offsets = [0, 0], sizes = [1, 128], strides = [1, 1]} : vector<2x128xf32> to vector<1x128xf32>
      %cst_17 = arith.constant 3.125000e-02 : f32
      %28 = vector.broadcast %cst_17 : f32 to vector<1x128xf32>
      %29 = arith.mulf %27, %28 : vector<1x128xf32>
      %30 = vector.extract_strided_slice %26 {offsets = [1, 0], sizes = [1, 128], strides = [1, 1]} : vector<2x128xf32> to vector<1x128xf32>
      %cst_18 = arith.constant 3.125000e-02 : f32
      %31 = vector.broadcast %cst_18 : f32 to vector<1x128xf32>
      %32 = arith.mulf %30, %31 : vector<1x128xf32>
      %33 = arith.mulf %29, %29 : vector<1x128xf32>
      %34 = arith.subf %32, %33 : vector<1x128xf32>
      %cst_19 = arith.constant 0.000000e+00 : f32
      %35 = vector.broadcast %cst_19 : f32 to vector<1x128xf32>
      %36 = arith.maximumf %34, %35 : vector<1x128xf32>
      %cst_20 = arith.constant 9.99999974E-6 : f32
      %37 = vector.broadcast %cst_20 : f32 to vector<1x128xf32>
      %38 = arith.addf %36, %37 : vector<1x128xf32>
      %39 = math.rsqrt %38 : vector<1x128xf32>
      %c0_21 = arith.constant 0 : index
      %c0_22 = arith.constant 0 : index
      %40 = vector.load %arg4[%c0_21, %c0_22] : memref<1x128xf32, #tpu.memory_space<vmem>>, vector<1x128xf32>
      %41 = arith.mulf %39, %40 : vector<1x128xf32>
      %c0_23 = arith.constant 0 : index
      %c0_24 = arith.constant 0 : index
      %42 = vector.load %arg5[%c0_23, %c0_24] : memref<1x128xf32, #tpu.memory_space<vmem>>, vector<1x128xf32>
      %43 = arith.mulf %29, %41 : vector<1x128xf32>
      %44 = arith.subf %42, %43 : vector<1x128xf32>
      %c0_i32_25 = arith.constant 0 : i32
      %c32_i32_26 = arith.constant 32 : i32
      %45 = arith.muli %c0_i32_25, %c32_i32_26 : i32
      %46 = tpu.assume_multiple %45, 32 : i32
      %47 = arith.index_cast %46 : i32 to index
      %c0_27 = arith.constant 0 : index
      %48 = vector.load %arg6[%47, %c0_27] : memref<32x128xbf16, #tpu.memory_space<vmem>>, vector<32x128xbf16>
      %49 = arith.extf %48 : vector<32x128xbf16> to vector<32x128xf32>
      %50 = vector.broadcast %41 : vector<1x128xf32> to vector<32x128xf32>
      %51 = arith.mulf %49, %50 : vector<32x128xf32>
      %52 = vector.broadcast %44 : vector<1x128xf32> to vector<32x128xf32>
      %53 = arith.addf %51, %52 : vector<32x128xf32>
      %cst_28 = arith.constant 0.000000e+00 : f32
      %54 = vector.broadcast %cst_28 : f32 to vector<32x128xf32>
      %55 = arith.cmpf oge, %53, %54 : vector<32x128xf32>
      %cst_29 = arith.constant 2.000000e-01 : f32
      %56 = vector.broadcast %cst_29 : f32 to vector<32x128xf32>
      %57 = arith.mulf %56, %53 : vector<32x128xf32>
      %58 = arith.select %55, %53, %57 : vector<32x128xi1>, vector<32x128xf32>
      %59 = arith.truncf %58 : vector<32x128xf32> to vector<32x128xbf16>
      %60 = arith.index_cast %46 : i32 to index
      %c0_30 = arith.constant 0 : index
      %61 = vector.load %arg6[%60, %c0_30] : memref<32x128xbf16, #tpu.memory_space<vmem>>, vector<32x128xbf16>
      tpu.vector_store %arg6[%60, %c0_30], %59 {strides = array<i32>} : memref<32x128xbf16, #tpu.memory_space<vmem>>, vector<32x128xbf16>,
      %c1_i32 = arith.constant 1 : i32
    } else {
    }
    return
  }
  func.func @transform_0(%arg0: i32) -> (i32, i32) {
    %c0_i32 = arith.constant 0 : i32
    %c0_i32_0 = arith.constant 0 : i32
    return %arg0, %c0_i32 : i32, i32
  }
  func.func @transform_1(%arg0: i32) -> (i32, i32) {
    %c0_i32 = arith.constant 0 : i32
    %c0_i32_0 = arith.constant 0 : i32
    %c0_i32_1 = arith.constant 0 : i32
    return %c0_i32, %c0_i32_0 : i32, i32
  }
  func.func @transform_2(%arg0: i32) -> (i32, i32) {
    %c0_i32 = arith.constant 0 : i32
    %c0_i32_0 = arith.constant 0 : i32
    %c0_i32_1 = arith.constant 0 : i32
    return %c0_i32, %c0_i32_0 : i32, i32
  }
  func.func @transform_3(%arg0: i32) -> (i32, i32) {
    %c0_i32 = arith.constant 0 : i32
    %c0_i32_0 = arith.constant 0 : i32
    %c0_i32_1 = arith.constant 0 : i32
    return %c0_i32, %c0_i32_0 : i32, i32
  }
  func.func @transform_4(%arg0: i32) -> (i32, i32) {
    %c0_i32 = arith.constant 0 : i32
    %c0_i32_0 = arith.constant 0 : i32
    %c0_i32_1 = arith.constant 0 : i32
    return %c0_i32, %c0_i32_0 : i32, i32
  }
  func.func @transform_5(%arg0: i32) -> (i32, i32) {
    %c0_i32 = arith.constant 0 : i32
    %c0_i32_0 = arith.constant 0 : i32
    %c0_i32_1 = arith.constant 0 : i32
    return %c0_i32, %c0_i32_0 : i32, i32
  }
}

</mosaic_0001>

<bundles_post_ra>
// kernel: discriminator_forward.2
= control target key start
LH: loop header
LB: loop body
LE: loop exit
PB: predicated region body
PF: predicated region fallthrough
CT: control target
= control target key end

     0   :  { %s672_s1 = inlined_call_operand.vmem [shape: bf16[128,128], index: 1, kind: input, shape index: {}]   ;;  %s673_s0 = inlined_call_operand.vmem [shape: bf16[128,128], index: 0, kind: input, shape index: {}]   ;;  %s674_s2 = inlined_call_operand.vmem [shape: f32[1,128], index: 2, kind: input, shape index: {}]   ;;  %s675_s3 = inlined_call_operand.vmem [shape: bf16[128,128], index: 3, kind: output, shape index: {}]  }
   0x1   :  { %v539_v0 = vld [vmem:[%s672_s1] sm:$0xff]   ;;  %v540_v1 = vld [vmem:[%s672_s1 + $0x8] sm:$0xff]   ;;  %v541_v2 = vld [vmem:[%s672_s1 + $0x10] sm:$0xff]  }
   0x2   :  { %491 = vmatprep.subr.bf16.mxu0 %v539_v0  ;;  %523 = vmatprep.subr.bf16.mxu1 %v539_v0  ;;  %v542_v3 = vld [vmem:[%s672_s1 + $0x18] sm:$0xff]   ;;  %v547_v4 = vld [vmem:[%s673_s0] sm:$0xff]   ;;  %v544_v7 = vld [vmem:[%s672_s1 + $0x28] sm:$0xff]  }
   0x3   :  { %492 = vmatpush3.bf16.msra.mxu0 %v539_v0  ;;  %531 = vmatpush3.bf16.msra.mxu1 %v539_v0  ;;  %v548_v5 = vld [vmem:[%s673_s0 + $0x20] sm:$0xff]   ;;  %v545_v8 = vld [vmem:[%s672_s1 + $0x30] sm:$0xff]   ;;  %v546_v9 = vld [vmem:[%s672_s1 + $0x38] sm:$0xff]  }
   0x4   :  { %493 = vmatprep.subr.bf16.mxu0 %v540_v1  ;;  %524 = vmatprep.subr.bf16.mxu1 %v540_v1  ;;  %v543_v6 = vld [vmem:[%s672_s1 + $0x20] sm:$0xff]   ;;  %v549_v10 = vld [vmem:[%s673_s0 + $0x8] sm:$0xff]   ;;  %v551_v12 = vld [vmem:[%s673_s0 + $0x10] sm:$0xff]  }
   0x5   :  { %507 = vmatprep.mubr.bf16.mxu0 %v547_v4  ;;  %515 = vmatprep.mubr.bf16.mxu1 %v548_v5  ;;  %v550_v11 = vld [vmem:[%s673_s0 + $0x28] sm:$0xff]   ;;  %v552_v13 = vld [vmem:[%s673_s0 + $0x30] sm:$0xff]   ;;  %v553_v14 = vld [vmem:[%s673_s0 + $0x18] sm:$0xff]  }
   0x6   :  { %v554_v15 = vld [vmem:[%s673_s0 + $0x38] sm:$0xff]   ;;  %v626_v16 = vld [vmem:[%s674_s2] ss:$0 sm:$0xff] }
   0x7   :  { %494 = vmatpush3.bf16.msra.mxu0 %v540_v1  ;;  %532 = vmatpush3.bf16.msra.mxu1 %v540_v1 }
   0x8   :  { %495 = vmatprep.subr.bf16.mxu0 %v541_v2  ;;  %525 = vmatprep.subr.bf16.mxu1 %v541_v2 }
   0xb   :  { %496 = vmatpush3.bf16.msra.mxu0 %v541_v2  ;;  %533 = vmatpush3.bf16.msra.mxu1 %v541_v2 }
   0xc   :  { %497 = vmatprep.subr.bf16.mxu0 %v542_v3  ;;  %526 = vmatprep.subr.bf16.mxu1 %v542_v3 }
   0xf   :  { %498 = vmatpush3.bf16.msra.mxu0 %v542_v3  ;;  %534 = vmatpush3.bf16.msra.mxu1 %v542_v3 }
  0x10   :  { %499 = vmatprep.subr.bf16.mxu0 %v543_v6  ;;  %527 = vmatprep.subr.bf16.mxu1 %v543_v6 }
  0x13   :  { %500 = vmatpush3.bf16.msra.mxu0 %v543_v6  ;;  %535 = vmatpush3.bf16.msra.mxu1 %v543_v6 }
  0x14   :  { %501 = vmatprep.subr.bf16.mxu0 %v544_v7  ;;  %528 = vmatprep.subr.bf16.mxu1 %v544_v7 }
  0x17   :  { %502 = vmatpush3.bf16.msra.mxu0 %v544_v7  ;;  %536 = vmatpush3.bf16.msra.mxu1 %v544_v7 }
  0x18   :  { %503 = vmatprep.subr.bf16.mxu0 %v545_v8  ;;  %529 = vmatprep.subr.bf16.mxu1 %v545_v8 }
  0x1b   :  { %504 = vmatpush3.bf16.msra.mxu0 %v545_v8  ;;  %537 = vmatpush3.bf16.msra.mxu1 %v545_v8 }
  0x1c   :  { %505 = vmatprep.subr.bf16.mxu0 %v546_v9  ;;  %530 = vmatprep.subr.bf16.mxu1 %v546_v9 }
  0x1f   :  { %506 = vmatpush3.bf16.msra.mxu0 %v546_v9  ;;  %538 = vmatpush3.bf16.msra.mxu1 %v546_v9 }
  0x22   :  { %508 = vmatmul.mubr.bf16.vlgmr.msra.gmra.mrb[0].mxu0 %v549_v10  ;;  %516 = vmatmul.mubr.bf16.vlgmr.msra.gmra.mrb[0].mxu1 %v550_v11 }
  0x23   :  { %511 = vmatprep.mubr.bf16.mxu0 %v551_v12  ;;  %519 = vmatprep.mubr.bf16.mxu1 %v552_v13 }
  0x2a   :  { %512 = vmatmul.mubr.bf16.gmra.mrb[4].mxu0 %v553_v14  ;;  %520 = vmatmul.mubr.bf16.gmra.mrb[4].mxu1 %v554_v15 }
  0xf5   :  { %v509_v17 = vpop.f32.mrb[0].mxu0  ;;  %v517_v18 = vpop.f32.mrb[0].mxu1 }
  0xf6   :  { %v193_v19 = vadd.f32 %v509_v17, %v626_v16  ;;  %v225_v20 = vadd.f32 %v517_v18, %v626_v16  ;;  %v184_v21 = vpop.f32.mrb[1].mxu0  ;;  %v216_v22 = vpop.f32.mrb[1].mxu1 }
  0xf7   :  { %v185_v23 = vadd.f32 %v626_v16, %v184_v21  ;;  %v217_v24 = vadd.f32 %v626_v16, %v216_v22  ;;  %v510_v25 = vpop.f32.mrb[2].mxu0  ;;  %v518_v26 = vpop.f32.mrb[2].mxu1 }
  0xf8   :  { %vm249_vm0 = vcmp.ge.f32.partialorder %v193_v19, 0.0  ;;  %v265_v27 = vmul.f32 0.2, %v193_v19  ;;  %vm257_vm1 = vcmp.ge.f32.partialorder %v225_v20, 0.0  ;;  %v273_v28 = vmul.f32 0.2, %v225_v20 }
  0xf9   :  { %vm247_vm2 = vcmp.ge.f32.partialorder %v185_v23, 0.0  ;;  %v263_v29 = vmul.f32 0.2, %v185_v23  ;;  %vm255_vm3 = vcmp.ge.f32.partialorder %v217_v24, 0.0  ;;  %v271_v30 = vmul.f32 0.2, %v217_v24 }
  0xfa   :  { %v196_v31 = vadd.f32 %v510_v25, %v626_v16  ;;  %v228_v32 = vadd.f32 %v518_v26, %v626_v16  ;;  %v187_v33 = vpop.f32.mrb[3].mxu0  ;;  %v219_v34 = vpop.f32.mrb[3].mxu1  ;;  %v281_v35 = vsel %vm249_vm0, %v193_v19, %v265_v27  ;;  %v289_v36 = vsel %vm257_vm1, %v225_v20, %v273_v28 }
  0xfb   :  { %v188_v37 = vadd.f32 %v626_v16, %v187_v33  ;;  %v220_v38 = vadd.f32 %v626_v16, %v219_v34  ;;  %v279_v43 = vsel %vm247_vm2, %v185_v23, %v263_v29  ;;  %v287_v44 = vsel %vm255_vm3, %v217_v24, %v271_v30 }
  0xfc   :  { %vm250_vm4 = vcmp.ge.f32.partialorder %v196_v31, 0.0  ;;  %v266_v39 = vmul.f32 0.2, %v196_v31  ;;  %vm258_vm5 = vcmp.ge.f32.partialorder %v228_v32, 0.0  ;;  %v274_v40 = vmul.f32 0.2, %v228_v32 }
  0xfd   :  { %vm248_vm6 = vcmp.ge.f32.partialorder %v188_v37, 0.0  ;;  %v264_v41 = vmul.f32 0.2, %v188_v37  ;;  %vm256_vm7 = vcmp.ge.f32.partialorder %v220_v38, 0.0  ;;  %v272_v42 = vmul.f32 0.2, %v220_v38 }
  0xfe   :  { %v282_v45 = vsel %vm250_vm4, %v196_v31, %v266_v39  ;;  %v290_v46 = vsel %vm258_vm5, %v228_v32, %v274_v40  ;;  %v513_v47 = vpop.f32.mrb[4].mxu0  ;;  %v521_v48 = vpop.f32.mrb[4].mxu1 }
  0xff   :  { %v436_v49 = vpack.c.bf16 %v282_v45, %v281_v35  ;;  %v456_v50 = vpack.c.bf16 %v290_v46, %v289_v36  ;;  %v280_v51 = vsel %vm248_vm6, %v188_v37, %v264_v41  ;;  %v288_v52 = vsel %vm256_vm7, %v220_v38, %v272_v42  ;;  %v200_v53 = vpop.f32.mrb[5].mxu0  ;;  %v232_v54 = vpop.f32.mrb[5].mxu1 }
 0x100   :  { %v431_v55 = vpack.c.bf16 %v280_v51, %v279_v43  ;;  %v451_v56 = vpack.c.bf16 %v288_v52, %v287_v44  ;;  %v209_v57 = vadd.f32 %v513_v47, %v626_v16  ;;  %v241_v58 = vadd.f32 %v521_v48, %v626_v16  ;;  %v514_v59 = vpop.f32.mrb[6].mxu0  ;;  %v522_v60 = vpop.f32.mrb[6].mxu1 }
 0x101   :  { %468 = vst [vmem:[%s675_s3 + $0x8] sm:$0xff] %v436_v49   ;;  %472 = vst [vmem:[%s675_s3 + $0x28] sm:$0xff] %v456_v50   ;;  %v201_v61 = vadd.f32 %v626_v16, %v200_v53  ;;  %v233_v62 = vadd.f32 %v626_v16, %v232_v54  ;;  %v212_v63 = vadd.f32 %v514_v59, %v626_v16  ;;  %v203_v1 = vpop.f32.mrb[7].mxu0  ;;  %v235_v2 = vpop.f32.mrb[7].mxu1 }
 0x102   :  { %v244_v0 = vadd.f32 %v522_v60, %v626_v16  ;;  %432 = vst [vmem:[%s675_s3] sm:$0xff] %v431_v55   ;;  %471 = vst [vmem:[%s675_s3 + $0x20] sm:$0xff] %v451_v56   ;;  %v269_v3 = vmul.f32 0.2, %v209_v57  ;;  %vm253_vm8 = vcmp.ge.f32.partialorder %v209_v57, 0.0  ;;  %v277_v4 = vmul.f32 0.2, %v241_v58 }
 0x103   :  { %vm261_vm9 = vcmp.ge.f32.partialorder %v241_v58, 0.0  ;;  %vm251_vm10 = vcmp.ge.f32.partialorder %v201_v61, 0.0  ;;  %vm254_vm11 = vcmp.ge.f32.partialorder %v212_v63, 0.0  ;;  %v270_v5 = vmul.f32 0.2, %v212_v63 }
 0x104   :  { %v267_v6 = vmul.f32 0.2, %v201_v61  ;;  %vm259_vm12 = vcmp.ge.f32.partialorder %v233_v62, 0.0  ;;  %vm262_vm13 = vcmp.ge.f32.partialorder %v244_v0, 0.0  ;;  %v278_v7 = vmul.f32 0.2, %v244_v0 }
 0x105   :  { %v285_v8 = vsel %vm253_vm8, %v209_v57, %v269_v3  ;;  %v286_v9 = vsel %vm254_vm11, %v212_v63, %v270_v5  ;;  %v204_v10 = vadd.f32 %v626_v16, %v203_v1  ;;  %v236_v11 = vadd.f32 %v626_v16, %v235_v2 }
 0x106   :  { %v293_v12 = vsel %vm261_vm9, %v241_v58, %v277_v4  ;;  %v275_v13 = vmul.f32 0.2, %v233_v62  ;;  %v446_v14 = vpack.c.bf16 %v286_v9, %v285_v8  ;;  %v294_v15 = vsel %vm262_vm13, %v244_v0, %v278_v7 }
 0x107   :  { %v466_v17 = vpack.c.bf16 %v294_v15, %v293_v12  ;;  %vm252_vm14 = vcmp.ge.f32.partialorder %v204_v10, 0.0  ;;  %v268_v18 = vmul.f32 0.2, %v204_v10  ;;  %vm260_vm15 = vcmp.ge.f32.partialorder %v236_v11, 0.0 }
 0x108   :  { %470 = vst [vmem:[%s675_s3 + $0x18] sm:$0xff] %v446_v14   ;;  %v276_v19 = vmul.f32 0.2, %v236_v11  ;;  %v283_v20 = vsel %vm251_vm10, %v201_v61, %v267_v6  ;;  %v291_v21 = vsel %vm259_vm12, %v233_v62, %v275_v13 }
 0x109   :  { %474 = vst [vmem:[%s675_s3 + $0x38] sm:$0xff] %v466_v17   ;;  %v284_v16 = vsel %vm252_vm14, %v204_v10, %v268_v18 }
 0x10a   :  { %v441_v22 = vpack.c.bf16 %v284_v16, %v283_v20  ;;  %v292_v23 = vsel %vm260_vm15, %v236_v11, %v276_v19 }
 0x10b   :  { %v461_v24 = vpack.c.bf16 %v292_v23, %v291_v21 }
 0x10c   :  { %469 = vst [vmem:[%s675_s3 + $0x10] sm:$0xff] %v441_v22  }
 0x10d   :  { %473 = vst [vmem:[%s675_s3 + $0x30] sm:$0xff] %v461_v24  }

// kernel: discriminator_forward.3
= control target key start
LH: loop header
LB: loop body
LE: loop exit
PB: predicated region body
PF: predicated region fallthrough
CT: control target
= control target key end

     0   :  { %v407_v10 = vmov 0.0   ;;  %vm210_vm0 = vcmask 1040384   ;;  %v249_v54 = vlaneseq  ;;  %s483_s1 = inlined_call_operand.vmem [shape: bf16[128,128], index: 1, kind: input, shape index: {}]   ;;  %s484_s0 = inlined_call_operand.vmem [shape: bf16[32,128], index: 0, kind: input, shape index: {}]   ;;  %s485_s2 = inlined_call_operand.vmem [shape: f32[1,128], index: 2, kind: input, shape index: {}]   ;;  %s486_s3 = inlined_call_operand.vmem [shape: f32[1,128], index: 3, kind: input, shape index: {}]   ;;  %s487_s4 = inlined_call_operand.vmem [shape: f32[1,128], index: 4, kind: input, shape index: {}]   ;;  %s488_s5 = inlined_call_operand.vmem [shape: bf16[32,128], index: 5, kind: output, shape index: {}]  }
   0x1   :  { %v395_v0 = vld [vmem:[%s483_s1] sm:$0xff]   ;;  %v396_v1 = vld [vmem:[%s483_s1 + $0x8] sm:$0xff]   ;;  %v397_v2 = vld [vmem:[%s483_s1 + $0x10] sm:$0xff]   ;;  %25 = vst [vmem:[#allocation2] sm:$0x3] %v407_v10 }
   0x2   :  { %374 = vmatprep.subr.bf16.mxu0 %v395_v0  ;;  %v398_v3 = vld [vmem:[%s483_s1 + $0x18] sm:$0xff]   ;;  %v403_v4 = vld [vmem:[%s484_s0] sm:$0xff]   ;;  %v400_v6 = vld [vmem:[%s483_s1 + $0x28] sm:$0xff]   ;;  %v250_v55 = vshrl.u32 %v249_v54, 7 }
   0x3   :  { %375 = vmatpush3.bf16.msra.mxu0 %v395_v0  ;;  %390 = vmatprep.mubr.bf16.mxu0 %v403_v4  ;;  %v399_v5 = vld [vmem:[%s483_s1 + $0x20] sm:$0xff]   ;;  %v401_v7 = vld [vmem:[%s483_s1 + $0x30] sm:$0xff]   ;;  %v402_v8 = vld [vmem:[%s483_s1 + $0x38] sm:$0xff]  }
   0x4   :  { %376 = vmatprep.subr.bf16.mxu0 %v396_v1  ;;  %v404_v9 = vld [vmem:[%s484_s0 + $0x8] sm:$0xff]   ;;  %v305_v11 = vld [vmem:[%s485_s2] ss:$0 sm:$0xff]  ;;  %v251_v58 = vsub.s32 1, %v250_v55  ;;  %v260_v0 = vsub.s32 0, %v250_v55 }
   0x5   :  { %v320_v56 = vld [vmem:[%s486_s3] ss:$0 sm:$0xff] }
   0x6   :  { %v235_v61 = vld [vmem:[%s487_s4] sm:$0x1] }
   0x7   :  { %377 = vmatpush3.bf16.msra.mxu0 %v396_v1 }
   0x8   :  { %378 = vmatprep.subr.bf16.mxu0 %v397_v2  ;;  %v187_v42 = vld [vmem:[#allocation2] sm:$0x3] }
   0xb   :  { %379 = vmatpush3.bf16.msra.mxu0 %v397_v2 }
   0xc   :  { %380 = vmatprep.subr.bf16.mxu0 %v398_v3 }
   0xf   :  { %381 = vmatpush3.bf16.msra.mxu0 %v398_v3 }
  0x10   :  { %382 = vmatprep.subr.bf16.mxu0 %v399_v5 }
  0x13   :  { %383 = vmatpush3.bf16.msra.mxu0 %v399_v5 }
  0x14   :  { %384 = vmatprep.subr.bf16.mxu0 %v400_v6 }
  0x17   :  { %385 = vmatpush3.bf16.msra.mxu0 %v400_v6 }
  0x18   :  { %386 = vmatprep.subr.bf16.mxu0 %v401_v7 }
  0x1b   :  { %387 = vmatpush3.bf16.msra.mxu0 %v401_v7 }
  0x1c   :  { %388 = vmatprep.subr.bf16.mxu0 %v402_v8 }
  0x1f   :  { %389 = vmatpush3.bf16.msra.mxu0 %v402_v8 }
  0x22   :  { %391 = vmatmul.mubr.bf16.vlgmr.msra.gmra.mrb[0].mxu0 %v404_v9 }
  0xf5   :  { %v392_v12 = vpop.f32.mrb[0].mxu0 }
  0xf6   :  { %v147_v13 = vpop.f32.mrb[1].mxu0  ;;  %v156_v16 = vadd.f32 %v392_v12, %v305_v11 }
  0xf7   :  { %v148_v14 = vadd.f32 %v305_v11, %v147_v13  ;;  %v393_v15 = vpop.f32.mrb[2].mxu0 }
  0xf8   :  { %v159_v17 = vadd.f32 %v393_v15, %v305_v11  ;;  %v150_v18 = vpop.f32.mrb[3].mxu0  ;;  %v199_v25 = vmul.f32 %v156_v16, %v156_v16 }
  0xf9   :  { %v151_v19 = vadd.f32 %v305_v11, %v150_v18  ;;  %v197_v21 = vmul.f32 %v148_v14, %v148_v14 }
  0xfa   :  { %v341_v20 = vpack.c.bf16 %v159_v17, %v156_v16  ;;  %v200_v28 = vmul.f32 %v159_v17, %v159_v17 }
  0xfb   :  { %v336_v22 = vpack.c.bf16 %v151_v19, %v148_v14  ;;  %v188_v23 = vadd.f32 %v151_v19, %v148_v14  ;;  %v198_v24 = vmul.f32 %v151_v19, %v151_v19 }
  0xfc   :  { %v349_v2 = vunpack.c.l.bf16 %v341_v20  ;;  %v350_v3 = vunpack.c.h.bf16 %v341_v20 }
  0xfd   :  { %v189_v26 = vadd.f32 %v188_v23, %v156_v16  ;;  %v201_v27 = vadd.f32 %v198_v24, %v197_v21  ;;  %v345_v1 = vunpack.c.l.bf16 %v336_v22  ;;  %v346_v5 = vunpack.c.h.bf16 %v336_v22 }
  0xff   :  { %v190_v29 = vadd.f32 %v189_v26, %v159_v17  ;;  %v202_v30 = vadd.f32 %v201_v27, %v199_v25 }
 0x101   :  { %v191_v31 = vrot.slane %v190_v29, 4  ;;  %v203_v32 = vadd.f32 %v202_v30, %v200_v28 }
 0x103   :  { %v192_v33 = vadd.f32 %v191_v31, %v190_v29  ;;  %v204_v34 = vrot.slane %v203_v32, 4 }
 0x105   :  { %v193_v35 = vrot.slane %v192_v33, 2  ;;  %v205_v36 = vadd.f32 %v204_v34, %v203_v32 }
 0x107   :  { %v194_v37 = vadd.f32 %v193_v35, %v192_v33  ;;  %v206_v38 = vrot.slane %v205_v36, 2 }
 0x109   :  { %v195_v39 = vrot.slane %v194_v37, 1  ;;  %v207_v40 = vadd.f32 %v206_v38, %v205_v36 }
 0x10b   :  { %v208_v41 = vrot.slane %v207_v40, 1  ;;  %v196_v43 = vadd.f32 %v195_v39, %v194_v37 }
 0x10d   :  { %v209_v44 = vadd.f32 %v208_v41, %v207_v40 }
 0x10f   :  { %v211_v45 = vsel %vm210_vm0, %v196_v43, %v209_v44 }
 0x110   :  { %v212_v46 = vadd.f32 %v211_v45, %v187_v42 }
 0x112   :  { %213 = vst [vmem:[#allocation2] sm:$0x3] %v212_v46 }
 0x119   :  { %v217_v47 = vld [vmem:[#allocation2] sm:$0x3] }
 0x11a   :  { %v218_v48 = vmul.f32 0.03125, %v217_v47 }
 0x11c   :  { %v219_v49 = vmul.f32 %v218_v48, %v218_v48 }
 0x11e   :  { %v221_v50 = vrot.slane %v219_v49, 7 }
 0x120   :  { %v223_v51 = vsub.f32 %v218_v48, %v221_v50 }
 0x122   :  { %v224_v52 = vmax.f32 %v223_v51, 0.0 }
 0x124   :  { %v225_v53 = vadd.f32 1e-05, %v224_v52 }
 0x126   :  { %405 = vrsqrt.f32 %v225_v53 }
 0x130   :  { %v406_v57 = vpop.eup %405 }
 0x131   :  { %v234_v59 = vmul.f32 %v406_v57, %v320_v56 }
 0x133   :  { %v237_v60 = vrot.slane %v234_v59, 1  ;;  %v252_v62 = vrot.slane %v234_v59, %v251_v58 }
 0x135   :  { %v239_v63 = vmul.f32 %v237_v60, %v218_v48  ;;  %v253_v6 = vmul.f32 %v345_v1, %v252_v62  ;;  %v254_v7 = vmul.f32 %v346_v5, %v252_v62  ;;  %v255_v8 = vmul.f32 %v349_v2, %v252_v62 }
 0x136   :  { %v256_v9 = vmul.f32 %v350_v3, %v252_v62 }
 0x137   :  { %v240_v4 = vsub.f32 %v235_v61, %v239_v63 }
 0x139   :  { %v261_v10 = vrot.slane %v240_v4, %v260_v0 }
 0x13b   :  { %v263_v11 = vadd.f32 %v261_v10, %v253_v6  ;;  %v264_v12 = vadd.f32 %v261_v10, %v254_v7  ;;  %v265_v13 = vadd.f32 %v261_v10, %v255_v8  ;;  %v266_v14 = vadd.f32 %v261_v10, %v256_v9 }
 0x13d   :  { %vm267_vm1 = vcmp.ge.f32.partialorder %v263_v11, 0.0  ;;  %vm268_vm2 = vcmp.ge.f32.partialorder %v264_v12, 0.0  ;;  %vm269_vm3 = vcmp.ge.f32.partialorder %v265_v13, 0.0  ;;  %vm270_vm4 = vcmp.ge.f32.partialorder %v266_v14, 0.0 }
 0x13e   :  { %v271_v15 = vmul.f32 0.2, %v263_v11  ;;  %v272_v16 = vmul.f32 0.2, %v264_v12  ;;  %v273_v17 = vmul.f32 0.2, %v265_v13 }
 0x13f   :  { %v274_v18 = vmul.f32 0.2, %v266_v14 }
 0x140   :  { %v275_v19 = vsel %vm267_vm1, %v263_v11, %v271_v15  ;;  %v276_v20 = vsel %vm268_vm2, %v264_v12, %v272_v16  ;;  %v277_v21 = vsel %vm269_vm3, %v265_v13, %v273_v17 }
 0x141   :  { %v278_v22 = vsel %vm270_vm4, %v266_v14, %v274_v18  ;;  %v354_v23 = vpack.c.bf16 %v276_v20, %v275_v19 }
 0x142   :  { %v359_v24 = vpack.c.bf16 %v278_v22, %v277_v21 }
 0x143   :  { %355 = vst [vmem:[%s488_s5] sm:$0xff] %v354_v23  }
 0x144   :  { %363 = vst [vmem:[%s488_s5 + $0x8] sm:$0xff] %v359_v24  }

</bundles_post_ra>
